<compile_context>
chip_gen: v6e
topology: v6e:2x2x1
jax: 0.10.0
libtpu: 0.0.40
codegen_flags: <defaults>
</compile_context>

<pallas_src>
import jax
import jax.numpy as jnp
from jax.experimental import pallas as pl
from jax.experimental.pallas import tpu as pltpu

EPS = 1e-5


def _pool_head_kernel(masks_ref, feats_ref, scale_ref, shift_ref, out_ref):
    # masks_ref: [B, M, HW], feats_ref: [B, Dp, HW]  (input dtype, e.g. bf16)
    # Contract the lane (HW) dims directly -> MXU consumes transposed-B form,
    # no XLU transpose / VMEM relayout of the feature tile.
    pooled = jnp.einsum(
        "bmh,bdh->bmd", masks_ref[...], feats_ref[...],
        preferred_element_type=jnp.float32)                      # [B, M, Dp] f32
    # Folded eval-mode BatchNorm2d + 1/HW spatial average: one affine in f32.
    out_ref[...] = (pooled * scale_ref[...] + shift_ref[...]).astype(out_ref.dtype)


def global_mask_weighted_pooling_head(features, part_masks, gamma, beta,
                                      running_mean, running_var):
    """features: [N, D, H, W], part_masks: [N, M, H, W]  ->  [N, M, D] (float32)."""
    N, D, H, W = features.shape
    _, M, _, _ = part_masks.shape
    HW = H * W

    # Keep native input dtype (bf16 recommended): halves HBM traffic vs f32.
    feats = features.reshape(N, D, HW)
    masks = part_masks.reshape(N, M, HW)

    # Fold eval-mode BN affine and the 1/HW average into scale/shift ([1, D], f32).
    inv_std = jax.lax.rsqrt(running_var.astype(jnp.float32) + EPS)
    g = gamma.astype(jnp.float32) * inv_std
    scale = (g / float(HW)).reshape(1, D)
    shift = (beta.astype(jnp.float32)
             - running_mean.astype(jnp.float32) * g).reshape(1, D)

    # Lane-dense output: pad channel axis to a multiple of 128 (no-op for real
    # BPBReID depths 512/2048). Padded channels carry scale=shift=0 -> output 0.
    Dp = ((D + 127) // 128) * 128
    if Dp != D:
        feats = jnp.pad(feats, ((0, 0), (0, Dp - D), (0, 0)))
        scale = jnp.pad(scale, ((0, 0), (0, Dp - D)))
        shift = jnp.pad(shift, ((0, 0), (0, Dp - D)))

    # Batch several images per grid step to amortize the ~0.35 us/step overhead,
    # while keeping the double-buffered blocks inside a portable VMEM budget.
    in_bytes = feats.dtype.itemsize
    per_b = 2 * ((Dp * HW + M * HW) * in_bytes + M * Dp * 4)     # 2x = double buffer
    B = int(max(1, min(N, (12 * 1024 * 1024) // max(per_b, 1))))
    Np = ((N + B - 1) // B) * B
    if Np != N:
        feats = jnp.pad(feats, ((0, Np - N), (0, 0), (0, 0)))
        masks = jnp.pad(masks, ((0, Np - N), (0, 0), (0, 0)))

    out = pl.pallas_call(
        _pool_head_kernel,
        out_shape=jax.ShapeDtypeStruct((Np, M, Dp), jnp.float32),
        grid_spec=pltpu.PrefetchScalarGridSpec(
            num_scalar_prefetch=0,
            grid=(Np // B,),
            in_specs=[
                pl.BlockSpec((B, M, HW), lambda i: (i, 0, 0)),    # part masks
                pl.BlockSpec((B, Dp, HW), lambda i: (i, 0, 0)),   # features
                pl.BlockSpec((1, Dp), lambda i: (0, 0)),          # folded scale
                pl.BlockSpec((1, Dp), lambda i: (0, 0)),          # folded shift
            ],
            out_specs=pl.BlockSpec((B, M, Dp), lambda i: (i, 0, 0)),
        ),
        compiler_params=pltpu.CompilerParams(
            dimension_semantics=("parallel",),      # shards across TCs on v7x
            vmem_limit_bytes=32 * 1024 * 1024),
    )(masks, feats, scale, shift)

    return out[:N, :, :D]


def _reference(features, part_masks, gamma, beta, rm, rv):
    features = features.astype(jnp.float32)
    part_masks = part_masks.astype(jnp.float32)
    N, D, H, W = features.shape
    M = part_masks.shape[1]
    pf = part_masks[:, :, None] * features[:, None]              # [N, M, D, H, W]
    pf = pf.reshape(N * M, D, H, W)
    inv = jax.lax.rsqrt(rv.astype(jnp.float32) + EPS)
    pf = (pf - rm[None, :, None, None]) * inv[None, :, None, None]
    pf = pf * gamma[None, :, None, None] + beta[None, :, None, None]
    pooled = pf.mean(axis=(2, 3))                                # [N*M, D]
    return pooled.reshape(N, M, D)


if __name__ == "__main__":
    N, D, H, W = 2, 32, 16, 16   # batch, channels (depth), spatial
    M = 8                        # number of parts

    key = jax.random.PRNGKey(0)
    k1, k2, k3, k4, k5, k6 = jax.random.split(key, 6)
    features_f32 = jax.random.normal(k1, (N, D, H, W), dtype=jnp.float32)
    part_masks_f32 = jax.nn.softmax(
        jax.random.normal(k2, (N, M, H, W), dtype=jnp.float32), axis=1)

    # bf16 inputs (what the perf-optimal path feeds the kernel).
    features = features_f32.astype(jnp.bfloat16)
    part_masks = part_masks_f32.astype(jnp.bfloat16)

    # BatchNorm2d(depth=D) eval-mode parameters (non-trivial to exercise the fold).
    gamma = 1.0 + 0.1 * jax.random.normal(k3, (D,), jnp.float32)
    beta = 0.1 * jax.random.normal(k4, (D,), jnp.float32)
    running_mean = 0.1 * jax.random.normal(k5, (D,), jnp.float32)
    running_var = 0.5 + jnp.abs(jax.random.normal(k6, (D,), jnp.float32))

    out = global_mask_weighted_pooling_head(
        features, part_masks, gamma, beta, running_mean, running_var)
    out = jax.block_until_ready(out)

    # Reference computed from the same bf16-quantized inputs, in f32.
    ref = _reference(features, part_masks, gamma, beta, running_mean, running_var)
    assert out.shape == (N, M, D), out.shape
    assert jnp.allclose(out, ref, atol=1e-3, rtol=1e-3), "mismatch vs reference"

    print("KERNEL_OK")
</pallas_src>

<mosaic_0001>
module attributes {stable_mosaic.version = 11 : i64} {
  func.func @_pool_head_kernel(%arg0: i32, %arg1: memref<2x8x256xbf16, #tpu.memory_space<vmem>>, %arg2: memref<2x128x256xbf16, #tpu.memory_space<vmem>>, %arg3: memref<1x128xf32, #tpu.memory_space<vmem>>, %arg4: memref<1x128xf32, #tpu.memory_space<vmem>>, %arg5: memref<2x8x128xf32, #tpu.memory_space<vmem>>) attributes {dimension_semantics = [#tpu.dimension_semantics<parallel>], iteration_bounds = array<i64: 1>, scalar_prefetch = 0 : i64, scratch_operands = 0 : i64, tpu.core_type = #tpu.core_type<tc>, window_params = [{transform_indices = @transform_0, window_bounds = array<i64: 2, 8, 256>}, {transform_indices = @transform_1, window_bounds = array<i64: 2, 128, 256>}, {pipeline_mode = #tpu.pipeline_mode<synchronous>, transform_indices = @transform_2, window_bounds = array<i64: 1, 128>}, {pipeline_mode = #tpu.pipeline_mode<synchronous>, transform_indices = @transform_3, window_bounds = array<i64: 1, 128>}, {transform_indices = @transform_4, window_bounds = array<i64: 2, 8, 128>}]} {
    %c0 = arith.constant 0 : index
    %c0_0 = arith.constant 0 : index
    %c0_1 = arith.constant 0 : index
    %0 = vector.load %arg1[%c0, %c0_0, %c0_1] : memref<2x8x256xbf16, #tpu.memory_space<vmem>>, vector<2x8x256xbf16>
    %c0_2 = arith.constant 0 : index
    %c0_3 = arith.constant 0 : index
    %c0_4 = arith.constant 0 : index
    %1 = vector.load %arg2[%c0_2, %c0_3, %c0_4] : memref<2x128x256xbf16, #tpu.memory_space<vmem>>, vector<2x128x256xbf16>
    "tpu.trace_start"() <{level = 10 : i32, message = "bmh,bdh->bmd"}> : () -> ()
    %cst = arith.constant dense<0.000000e+00> : vector<2x8x128xf32>
    %2 = tpu.matmul %0, %1, %cst {dimension_numbers = #tpu.dot_dimension_numbers<[2], [2], [1], [1], [0, 0, 0, 1, 1, 1], [0], [0]>} : vector<2x8x256xbf16>, vector<2x128x256xbf16>, vector<2x8x128xf32> -> vector<2x8x128xf32>
    "tpu.trace_stop"() : () -> ()
    %c0_5 = arith.constant 0 : index
    %c0_6 = arith.constant 0 : index
    %3 = vector.load %arg3[%c0_5, %c0_6] : memref<1x128xf32, #tpu.memory_space<vmem>>, vector<1x128xf32>
    %4 = vector.shape_cast %3 : vector<1x128xf32> to vector<1x1x128xf32>
    %5 = vector.broadcast %4 : vector<1x1x128xf32> to vector<2x8x128xf32>
    %6 = arith.mulf %2, %5 : vector<2x8x128xf32>
    %c0_7 = arith.constant 0 : index
    %c0_8 = arith.constant 0 : index
    %7 = vector.load %arg4[%c0_7, %c0_8] : memref<1x128xf32, #tpu.memory_space<vmem>>, vector<1x128xf32>
    %8 = vector.shape_cast %7 : vector<1x128xf32> to vector<1x1x128xf32>
    %9 = vector.broadcast %8 : vector<1x1x128xf32> to vector<2x8x128xf32>
    %10 = arith.addf %6, %9 : vector<2x8x128xf32>
    %c0_9 = arith.constant 0 : index
    %c0_10 = arith.constant 0 : index
    %c0_11 = arith.constant 0 : index
    %11 = vector.load %arg5[%c0_9, %c0_10, %c0_11] : memref<2x8x128xf32, #tpu.memory_space<vmem>>, vector<2x8x128xf32>
    tpu.vector_store %arg5[%c0_9, %c0_10, %c0_11], %10 {strides = array<i32>} : memref<2x8x128xf32, #tpu.memory_space<vmem>>, vector<2x8x128xf32>,
    return
  }
  func.func @transform_0(%arg0: i32) -> (i32, i32, i32) {
    %c0_i32 = arith.constant 0 : i32
    %c0_i32_0 = arith.constant 0 : i32
    %c0_i32_1 = arith.constant 0 : i32
    return %arg0, %c0_i32, %c0_i32_0 : i32, i32, i32
  }
  func.func @transform_1(%arg0: i32) -> (i32, i32, i32) {
    %c0_i32 = arith.constant 0 : i32
    %c0_i32_0 = arith.constant 0 : i32
    %c0_i32_1 = arith.constant 0 : i32
    return %arg0, %c0_i32, %c0_i32_0 : i32, i32, i32
  }
  func.func @transform_2(%arg0: i32) -> (i32, i32) {
    %c0_i32 = arith.constant 0 : i32
    %c0_i32_0 = arith.constant 0 : i32
    %c0_i32_1 = arith.constant 0 : i32
    return %c0_i32, %c0_i32_0 : i32, i32
  }
  func.func @transform_3(%arg0: i32) -> (i32, i32) {
    %c0_i32 = arith.constant 0 : i32
    %c0_i32_0 = arith.constant 0 : i32
    %c0_i32_1 = arith.constant 0 : i32
    return %c0_i32, %c0_i32_0 : i32, i32
  }
  func.func @transform_4(%arg0: i32) -> (i32, i32, i32) {
    %c0_i32 = arith.constant 0 : i32
    %c0_i32_0 = arith.constant 0 : i32
    %c0_i32_1 = arith.constant 0 : i32
    return %arg0, %c0_i32, %c0_i32_0 : i32, i32, i32
  }
}

</mosaic_0001>

<bundles_post_ra>
// kernel: tpu_custom_call.1
= control target key start
LH: loop header
LB: loop body
LE: loop exit
PB: predicated region body
PF: predicated region fallthrough
CT: control target
= control target key end

     0   :  { %9 = vsyncpa [#allocation3], 0  ;;  %s588_s0 = inlined_call_operand.hbm [shape: bf16[2,8,256], index: 0, kind: input, shape index: {}]   ;;  %s589_s1 = inlined_call_operand.hbm [shape: bf16[2,128,256], index: 1, kind: input, shape index: {}]   ;;  %s590_s2 = inlined_call_operand.vmem [shape: f32[1,128], index: 2, kind: input, shape index: {}]   ;;  %s591_s3 = inlined_call_operand.vmem [shape: f32[1,128], index: 3, kind: input, shape index: {}]   ;;  %s592_s4 = inlined_call_operand.hbm [shape: f32[2,8,128], index: 4, kind: output, shape index: {}]  }
   0x1   :  { %10 = vsyncpa [#allocation6], 0 }
   0x2   :  { %11 = vsyncpa [#allocation4], 0  ;;  %s534_s15 = smov [#allocation2]  }
   0x3   :  { %s17_s16 = sshll.u32 %s534_s15, 4  ;;  %s18_s16 = int_to_ptr.vmem [resolvable:$true] %s17_s16 }
   0x4   :  { %s476_s17 = scalar_lea.vmem %s18_s16, 256  ;;  %p481_p1 = scmp.lt.s32.totalorder %s18_s16, %s18_s16 }
   0x5   :  { %p477_p0 = scmp.ne.s32.totalorder %s18_s16, %s476_s17  ;;  %p482_p2 = scmp.lt.s32.totalorder %s476_s17, %s476_s17 }
   0x7   :  { %p483_p3 = por %p482_p2, %p481_p1 }
   0x9   :  { %p484_p4 = pnand %p483_p3, %p477_p0 }
   0xb   :  { %487 = shalt.err (!%p484_p4)
}
   0xc   :  { %s535_s18 = smov 128   ;;  %s536_s19 = smov 8  }
   0xd   :  { %23 = dma.hbm_to_vmem [thread:$0]  %s588_s0, 256, %s18_s16, [#allocation3], %s535_s18, %s535_s18, %s536_s19  }
   0xe   :  { %s537_s22 = smov [#allocation5]  }
   0xf   :  { %s29_s23 = sshll.u32 %s537_s22, 4  ;;  %s30_s23 = int_to_ptr.vmem [resolvable:$true] %s29_s23 }
  0x10   :  { %s496_s24 = scalar_lea.vmem %s30_s23, 4096  ;;  %p501_p6 = scmp.lt.s32.totalorder %s30_s23, %s30_s23 }
  0x11   :  { %p497_p5 = scmp.ne.s32.totalorder %s30_s23, %s496_s24  ;;  %p502_p7 = scmp.lt.s32.totalorder %s496_s24, %s496_s24 }
  0x13   :  { %p503_p8 = por %p502_p7, %p501_p6 }
  0x15   :  { %p504_p9 = pnand %p503_p8, %p497_p5 }
  0x17   :  { %507 = shalt.err (!%p504_p9)
}
  0x18   :  { %35 = dma.hbm_to_vmem [thread:$0]  %s589_s1, 4096, %s30_s23, [#allocation6], %s535_s18, %s535_s18, %s536_s19  }
  0x19   :  { %528 = dma.done.wait [#allocation3], 256  }
  0x1a   :  { %529 = vsyncadd [#allocation3], 4294967040 }
  0x1b   :  { %530 = dma.done.wait [#allocation6], 4096  }
  0x1c   :  { %531 = vsyncadd [#allocation6], 4294963200  ;;  %v416_v0 = vld [vmem:[#allocation5 + $0x74] ss:$8 sps:$4 sm:$0xff]   ;;  %v420_v2 = vld [vmem:[#allocation5 + $0x70] ss:$8 sps:$4 sm:$0xff]  }
  0x1d   :  { %v418_v1 = vld [vmem:[#allocation5 + $0xf4] ss:$8 sps:$4 sm:$0xff]   ;;  %168 = vmatprep.subr.bf16.mxu0 %v416_v0  ;;  %v421_v3 = vld [vmem:[#allocation5 + $0xf0] ss:$8 sps:$4 sm:$0xff]   ;;  %v422_v4 = vld [vmem:[#allocation5 + $0x64] ss:$8 sps:$4 sm:$0xff]  }
  0x1e   :  { %295 = vmatprep.subr.bf16.mxu1 %v418_v1  ;;  %169 = vmatpush1.bf16.xpose.msra.mxu0 %v420_v2  ;;  %v424_v5 = vld [vmem:[#allocation5 + $0xe4] ss:$8 sps:$4 sm:$0xff]   ;;  %v426_v6 = vld [vmem:[#allocation5 + $0x60] ss:$8 sps:$4 sm:$0xff]   ;;  %v428_v8 = vld [vmem:[#allocation5 + $0x54] ss:$8 sps:$4 sm:$0xff]  }
  0x1f   :  { %296 = vmatpush1.bf16.xpose.msra.mxu1 %v421_v3  ;;  %170 = vmatprep.subr.bf16.mxu0 %v422_v4  ;;  %v427_v7 = vld [vmem:[#allocation5 + $0xe0] ss:$8 sps:$4 sm:$0xff]   ;;  %v430_v9 = vld [vmem:[#allocation5 + $0xd4] ss:$8 sps:$4 sm:$0xff]   ;;  %v432_v10 = vld [vmem:[#allocation5 + $0x50] ss:$8 sps:$4 sm:$0xff]  }
  0x20   :  { %297 = vmatprep.subr.bf16.mxu1 %v424_v5  ;;  %v433_v11 = vld [vmem:[#allocation5 + $0xd0] ss:$8 sps:$4 sm:$0xff]   ;;  %v434_v12 = vld [vmem:[#allocation5 + $0x44] ss:$8 sps:$4 sm:$0xff]   ;;  %v438_v18 = vld [vmem:[#allocation5 + $0x40] ss:$8 sps:$4 sm:$0xff]  }
  0x21   :  { %v436_v13 = vld [vmem:[#allocation5 + $0xc4] ss:$8 sps:$4 sm:$0xff]   ;;  %v47_v14 = vld [vmem:[#allocation2] sm:$0xff]  ;;  %v48_v15 = vld [vmem:[#allocation2 + $0x8] sm:$0xff]  ;;  %s538_s29 = smov [#allocation7]  }
  0x22   :  { %v374_v16 = vcombine.high %v47_v14, %v47_v14  ;;  %v392_v17 = vcombine.high %v48_v15, %v48_v15  ;;  %v439_v19 = vld [vmem:[#allocation5 + $0xc0] ss:$8 sps:$4 sm:$0xff]   ;;  %v440_v20 = vld [vmem:[#allocation5 + $0x34] ss:$8 sps:$4 sm:$0xff]   ;;  %v444_v22 = vld [vmem:[#allocation5 + $0x30] ss:$8 sps:$4 sm:$0xff]   ;;  %v373_v36 = vcombine.low %v47_v14, %v47_v14  ;;  %v391_v37 = vcombine.low %v48_v15, %v48_v15 }
  0x23   :  { %v442_v21 = vld [vmem:[#allocation5 + $0xb4] ss:$8 sps:$4 sm:$0xff]   ;;  %v445_v23 = vld [vmem:[#allocation5 + $0xb0] ss:$8 sps:$4 sm:$0xff]   ;;  %v446_v24 = vld [vmem:[#allocation5 + $0x24] ss:$8 sps:$4 sm:$0xff]  }
  0x24   :  { %200 = vmatprep.mubr.bf16.mxu0 %v374_v16  ;;  %327 = vmatprep.mubr.bf16.mxu1 %v392_v17  ;;  %v448_v25 = vld [vmem:[#allocation5 + $0xa4] ss:$8 sps:$4 sm:$0xff]   ;;  %v450_v26 = vld [vmem:[#allocation5 + $0x20] ss:$8 sps:$4 sm:$0xff]   ;;  %v452_v28 = vld [vmem:[#allocation5 + $0x14] ss:$8 sps:$4 sm:$0xff]  }
  0x25   :  { %v451_v27 = vld [vmem:[#allocation5 + $0xa0] ss:$8 sps:$4 sm:$0xff]   ;;  %v454_v29 = vld [vmem:[#allocation5 + $0x94] ss:$8 sps:$4 sm:$0xff]   ;;  %v456_v30 = vld [vmem:[#allocation5 + $0x10] ss:$8 sps:$4 sm:$0xff]  }
  0x26   :  { %171 = vmatpush1.bf16.xpose.msra.mxu0 %v426_v6  ;;  %v457_v31 = vld [vmem:[#allocation5 + $0x90] ss:$8 sps:$4 sm:$0xff]   ;;  %v458_v32 = vld [vmem:[#allocation5 + $0x4] ss:$8 sps:$4 sm:$0xff]   ;;  %v462_v34 = vld [vmem:[#allocation5] ss:$8 sps:$4 sm:$0xff]  }
  0x27   :  { %298 = vmatpush1.bf16.xpose.msra.mxu1 %v427_v7  ;;  %172 = vmatprep.subr.bf16.mxu0 %v428_v8  ;;  %v460_v33 = vld [vmem:[#allocation5 + $0x84] ss:$8 sps:$4 sm:$0xff]   ;;  %v463_v35 = vld [vmem:[#allocation5 + $0x80] ss:$8 sps:$4 sm:$0xff]   ;;  %v409_v38 = vld [vmem:[%s590_s2] ss:$0 sm:$0xff] }
  0x28   :  { %299 = vmatprep.subr.bf16.mxu1 %v430_v9  ;;  %v410_v40 = vld [vmem:[%s591_s3] ss:$0 sm:$0xff]  ;;  %s360_s30 = sshll.u32 %s538_s29, 4  ;;  %s361_s30 = int_to_ptr.vmem [resolvable:$true] %s360_s30 }
  0x29   :  { %s508_s2 = scalar_lea.vmem %s361_s30, 256  ;;  %p513_p11 = scmp.lt.s32.totalorder %s361_s30, %s361_s30 }
  0x2a   :  { %p509_p10 = scmp.ne.s32.totalorder %s361_s30, %s508_s2  ;;  %p514_p12 = scmp.lt.s32.totalorder %s508_s2, %s508_s2 }
  0x2c   :  { %p515_p13 = por %p514_p12, %p513_p11 }
  0x2e   :  { %173 = vmatpush1.bf16.xpose.msra.mxu0 %v432_v10  ;;  %p516_p0 = pnand %p515_p13, %p509_p10 }
  0x2f   :  { %300 = vmatpush1.bf16.xpose.msra.mxu1 %v433_v11  ;;  %174 = vmatprep.subr.bf16.mxu0 %v434_v12 }
  0x30   :  { %301 = vmatprep.subr.bf16.mxu1 %v436_v13 }
  0x36   :  { %175 = vmatpush1.bf16.xpose.msra.mxu0 %v438_v18 }
  0x37   :  { %302 = vmatpush1.bf16.xpose.msra.mxu1 %v439_v19  ;;  %176 = vmatprep.subr.bf16.mxu0 %v440_v20 }
  0x38   :  { %303 = vmatprep.subr.bf16.mxu1 %v442_v21 }
  0x3e   :  { %177 = vmatpush1.bf16.xpose.msra.mxu0 %v444_v22 }
  0x3f   :  { %304 = vmatpush1.bf16.xpose.msra.mxu1 %v445_v23  ;;  %178 = vmatprep.subr.bf16.mxu0 %v446_v24 }
  0x40   :  { %305 = vmatprep.subr.bf16.mxu1 %v448_v25 }
  0x46   :  { %179 = vmatpush1.bf16.xpose.msra.mxu0 %v450_v26 }
  0x47   :  { %306 = vmatpush1.bf16.xpose.msra.mxu1 %v451_v27  ;;  %180 = vmatprep.subr.bf16.mxu0 %v452_v28 }
  0x48   :  { %307 = vmatprep.subr.bf16.mxu1 %v454_v29 }
  0x4e   :  { %181 = vmatpush1.bf16.xpose.msra.mxu0 %v456_v30 }
  0x4f   :  { %308 = vmatpush1.bf16.xpose.msra.mxu1 %v457_v31  ;;  %182 = vmatprep.subr.bf16.mxu0 %v458_v32 }
  0x50   :  { %309 = vmatprep.subr.bf16.mxu1 %v460_v33 }
  0x56   :  { %183 = vmatpush1.bf16.xpose.msra.mxu0 %v462_v34 }
  0x57   :  { %310 = vmatpush1.bf16.xpose.msra.mxu1 %v463_v35 }
  0x5d   :  { %201 = vmatmul.mubr.bf16.vlgmr.msra.gmra.mxu0 %v373_v36 }
  0x5e   :  { %328 = vmatmul.mubr.bf16.vlgmr.msra.gmra.mxu1 %v391_v37 }
 0x11d   :  { %v202_v39 = vpop.f32.mrf.mxu0 }
 0x11e   :  { %v329_v41 = vpop.f32.mrf.mxu1  ;;  %v342_v42 = vmul.f32 %v409_v38, %v202_v39 }
 0x11f   :  { %v343_v43 = vmul.f32 %v409_v38, %v329_v41  ;;  %v204_v44 = vpop.f32.mrf.mxu0 }
 0x120   :  { %v331_v45 = vpop.f32.mrf.mxu1  ;;  %v351_v46 = vadd.f32 %v410_v40, %v342_v42 }
 0x121   :  { %v352_v47 = vadd.f32 %v410_v40, %v343_v43  ;;  %v205_v48 = vpop.f32.mrf.mxu0 }
 0x122   :  { %v332_v49 = vpop.f32.mrf.mxu1  ;;  %353 = vst [vmem:[#allocation7] sm:$0xff] %v351_v46 }
 0x123   :  { %354 = vst [vmem:[#allocation7 + $0x8] sm:$0xff] %v352_v47  ;;  %v206_v50 = vpop.f32.mrf.mxu0 }
 0x124   :  { %v333_v51 = vpop.f32.mrf.mxu1 }
 0x125   :  { %519 = shalt.err (!%p516_p0)
}
 0x126   :  { %366 = dma.vmem_to_hbm [thread:$0]  %s361_s30, 256, %s592_s4, [#allocation4], %s535_s18, %s535_s18, %s536_s19  }
 0x127   :  { %532 = dma.done.wait [#allocation4], 256  }
 0x128   :  { %533 = vsyncadd [#allocation4], 4294967040 }
 0x129   :  { %370 = vsyncpa [#allocation3], 1 }
 0x12a   :  { %371 = vsyncpa [#allocation6], 1 }
 0x12b   :  { %372 = vsyncpa [#allocation4], 1 }

</bundles_post_ra>
